<compile_context>
chip_gen: v6e
topology: v6e:2x2x1
jax: 0.10.0
libtpu: 0.0.40
codegen_flags: <defaults>
</compile_context>

<pallas_src>
import functools

import jax
import jax.numpy as jnp
from jax import lax
from jax.experimental import pallas as pl
from jax.experimental.pallas import tpu as pltpu


def _poolbn_kernel(x_ref, scale_ref, bias_ref, *rest,
                   K, s, H, W, C, pad, Ho, Wq, is_max):
    """Fused BN(inference) -> {max,avg} KxK pool for a block of Nb images.

    x_ref:      (Nb, H, W*C)    lane-dense unpadded input (input dtype)
    scale_ref:  (1, W*C)        folded BN scale, tiled over W (f32)
    bias_ref:   (1, W*C)        folded BN bias,  tiled over W (f32)
    invcnt_ref: (Ho, Wq*C)      1/valid-count per window (avg variant only)
    o_ref:      (Nb, Ho, Wq*C)  pooled output (row-strided starts, all W starts)
    ypad_ref:   (Nb, Hp, Wp*C)  VMEM scratch holding the padded, BN'd activation (f32)
    """
    if is_max:
        o_ref, ypad_ref = rest
        invcnt_ref = None
    else:
        invcnt_ref, o_ref, ypad_ref = rest

    Nb = x_ref.shape[0]
    Hp = H + 2 * pad
    Lp = (W + 2 * pad) * C                      # padded lane width
    pad_val = float("-inf") if is_max else 0.0

    # Thin halo border strips, rewritten every step with the pool identity.
    # (A fill-once scheme under pl.when(program_id==0) is cheaper per step but is
    # unsafe if the "parallel" batch axis is sharded across TensorCores, since the
    # second core never runs step 0; these strips are tiny -- 2*pad rows plus
    # 2*pad*C lanes -- so we pay them unconditionally.)
    if pad > 0:
        ypad_ref[:, 0:pad, :] = jnp.full((Nb, pad, Lp), pad_val, jnp.float32)
        ypad_ref[:, pad + H:Hp, :] = jnp.full((Nb, pad, Lp), pad_val, jnp.float32)
        ypad_ref[:, :, 0:pad * C] = jnp.full((Nb, Hp, pad * C), pad_val, jnp.float32)
        ypad_ref[:, :, (pad + W) * C:Lp] = jnp.full((Nb, Hp, pad * C), pad_val, jnp.float32)

    # BatchNorm (inference, folded scale/bias) computed in f32, stored into the
    # scratch interior (the only region overwritten each step).
    y = x_ref[...].astype(jnp.float32) * scale_ref[...] + bias_ref[...]
    ypad_ref[:, pl.ds(pad, H), pl.ds(pad * C, W * C)] = y

    red = jnp.maximum if is_max else jnp.add

    # Separable KxK pooling.  Each row tap is read directly from the scratch ref so
    # the full padded plane never lives in vregs; row taps subsample the window
    # starts with stride s (only Ho output rows), column taps are contiguous kj*C
    # lane shifts over all Wq window starts.
    def row_tap(ki):
        if s == 1:
            return ypad_ref[:, pl.ds(ki, Ho), :]
        return ypad_ref[:, pl.ds(ki, Ho, stride=s), :]

    r = row_tap(0)
    for ki in range(1, K):
        r = red(r, row_tap(ki))                                    # (Nb, Ho, Lp)

    q = r[:, :, 0:Wq * C]
    for kj in range(1, K):
        q = red(q, r[:, :, kj * C:kj * C + Wq * C])                # (Nb, Ho, Wq*C)

    if not is_max:
        q = q * invcnt_ref[...]                                    # count_include_pad=False

    o_ref[...] = q.astype(o_ref.dtype)


def _pick_block_n(N, per_image_bytes, budget_bytes=12 << 20):
    """Largest divisor of N fitting the VMEM budget, preferring >= 2 grid steps so
    both v7x TensorCores get work (v5e/v6e single-TC unaffected)."""
    divs = [d for d in range(1, N + 1) if N % d == 0]
    fit = [d for d in divs if d * per_image_bytes <= budget_bytes] or [1]
    pref = [d for d in fit if N // d >= 2]
    return max(pref) if pref else max(fit)


def poolbn_forward_nhwc(x_nhwc, params, *, pool_type, kernel_size, stride, padding,
                        eps=1e-5):
    """PoolBN forward on NHWC activations: (N, H, W, C) -> (N, Ho, Wo, C)."""
    pool_type = pool_type.lower()
    if pool_type not in ("max", "avg"):
        raise ValueError("invalid pooling layer type")
    N, H, W, C = x_nhwc.shape
    K, s, p = kernel_size, stride, padding
    Ho = (H + 2 * p - K) // s + 1
    Wo = (W + 2 * p - K) // s + 1
    Wq = s * (Wo - 1) + 1            # W window starts computed in-kernel (== Wo if s == 1)
    Hp, Wp = H + 2 * p, W + 2 * p
    is_max = pool_type == "max"
    dt = x_nhwc.dtype
    itemsize = jnp.dtype(dt).itemsize

    # Lane-dense layout: channels merged into the lane axis (free trailing reshape).
    # TODO(synk): for tiny W*C < 128 (as in the demo shapes) the output store is a
    # masked partial store; realistic channel counts make the lane dim >= 128.
    x = x_nhwc.reshape(N, H, W * C)

    # Folded inference BN: scale = gamma/sqrt(var+eps), bias = beta - mean*scale.
    # TODO(synk): PyTorch training-mode batch statistics / running-buffer updates are
    # not computed (inference semantics only).
    scale = (params["gamma"].astype(jnp.float32)
             / jnp.sqrt(params["rvar"].astype(jnp.float32) + eps))
    bias = (params["beta"].astype(jnp.float32)
            - params["rmean"].astype(jnp.float32) * scale)
    scale_l = jnp.tile(scale, W).reshape(1, W * C)
    bias_l = jnp.tile(bias, W).reshape(1, W * C)

    # VMEM-budgeted image batching (double-buffered input/output + f32 halo scratch).
    per_image = (2 * H * W * C * itemsize
                 + Hp * Wp * C * 4
                 + 2 * Ho * Wq * C * itemsize)
    Nb = _pick_block_n(N, per_image)
    grid = (N // Nb,)

    inputs = [x, scale_l, bias_l]
    in_specs = [
        pl.BlockSpec((Nb, H, W * C), lambda n: (n, 0, 0)),
        pl.BlockSpec((1, W * C), lambda n: (0, 0)),
        pl.BlockSpec((1, W * C), lambda n: (0, 0)),
    ]
    if not is_max:
        # count_include_pad=False reciprocal divisor, indexed at the strided row
        # starts and all Wq column starts (matching the kernel output grid).
        hh = jnp.arange(Ho, dtype=jnp.int32) * s
        ww = jnp.arange(Wq, dtype=jnp.int32)
        rows_valid = jnp.minimum(hh + K - 1, p + H - 1) - jnp.maximum(hh, p) + 1
        cols_valid = jnp.minimum(ww + K - 1, p + W - 1) - jnp.maximum(ww, p) + 1
        cnt = (rows_valid[:, None] * cols_valid[None, :]).astype(jnp.float32)
        invcnt = jnp.repeat(1.0 / cnt, C, axis=1)                  # (Ho, Wq*C)
        inputs.append(invcnt)
        in_specs.append(pl.BlockSpec((Ho, Wq * C), lambda n: (0, 0)))
    # Max variant: the divisor operand is dropped entirely (no HBM fetch, no
    # resident VMEM table) -- frees headroom that matters most on v7x.

    kernel = functools.partial(_poolbn_kernel, K=K, s=s, H=H, W=W, C=C, pad=p,
                               Ho=Ho, Wq=Wq, is_max=is_max)

    out = pl.pallas_call(
        kernel,
        out_shape=jax.ShapeDtypeStruct((N, Ho, Wq * C), dt),
        grid_spec=pltpu.PrefetchScalarGridSpec(
            num_scalar_prefetch=0,
            grid=grid,
            in_specs=in_specs,
            out_specs=pl.BlockSpec((Nb, Ho, Wq * C), lambda n: (n, 0, 0)),
            scratch_shapes=[pltpu.VMEM((Nb, Hp, Wp * C), jnp.float32)],
        ),
        compiler_params=pltpu.CompilerParams(dimension_semantics=("parallel",)),
    )(*inputs)

    out = out.reshape(N, Ho, Wq, C)
    if s > 1:
        # TODO(synk): the W-axis stride is applied here (strided slice of the already
        # row-strided output); a blocked-stride lane gather has no clean in-kernel
        # form with channels merged into the lane axis.
        out = out[:, :, ::s, :]
    return out                                                     # (N, Ho, Wo, C)


def poolbn_forward(x_nchw, params, *, pool_type, kernel_size, stride, padding, eps=1e-5):
    """NCHW (PyTorch-layout) compatibility wrapper around the NHWC-native kernel.
    Prefer poolbn_forward_nhwc end-to-end to avoid the two HBM transpose passes."""
    x = jnp.transpose(x_nchw, (0, 2, 3, 1))
    out = poolbn_forward_nhwc(x, params, pool_type=pool_type, kernel_size=kernel_size,
                              stride=stride, padding=padding, eps=eps)
    return jnp.transpose(out, (0, 3, 1, 2))


def poolbn_reference(x_nchw, params, *, pool_type, kernel_size, stride, padding, eps=1e-5):
    """Plain-JAX reference (BN inference + pool) used only for a correctness check."""
    K, s, p = kernel_size, stride, padding
    scale = params["gamma"] / jnp.sqrt(params["rvar"] + eps)
    bias = params["beta"] - params["rmean"] * scale
    y = jnp.transpose(x_nchw, (0, 2, 3, 1)).astype(jnp.float32)
    y = y * scale.reshape(1, 1, 1, -1) + bias.reshape(1, 1, 1, -1)
    dims, strd = (1, K, K, 1), (1, s, s, 1)
    pads = [(0, 0), (p, p), (p, p), (0, 0)]
    if pool_type.lower() == "max":
        out = lax.reduce_window(y, -jnp.inf, lax.max, dims, strd, pads)
    else:  # avg, count_include_pad=False
        ssum = lax.reduce_window(y, 0.0, lax.add, dims, strd, pads)
        cnt = lax.reduce_window(jnp.ones_like(y), 0.0, lax.add, dims, strd, pads)
        out = ssum / cnt
    return jnp.transpose(out, (0, 3, 1, 2))


def init_poolbn_params(key, C):
    k1, k2, k3 = jax.random.split(key, 3)
    return dict(
        gamma=1.0 + 0.1 * jax.random.normal(k1, (C,), jnp.float32),
        beta=0.1 * jax.random.normal(k2, (C,), jnp.float32),
        rmean=0.1 * jax.random.normal(k3, (C,), jnp.float32),
        rvar=jnp.ones((C,), jnp.float32),
    )


if __name__ == "__main__":
    key = jax.random.PRNGKey(0)
    N, C, H, W = 2, 4, 16, 16
    K, pad = 3, 1

    kx, kp = jax.random.split(key)
    x = jax.random.normal(kx, (N, C, H, W), jnp.float32)           # PyTorch NCHW layout
    params = init_poolbn_params(kp, C)

    for pool_type, s in (("max", 1), ("avg", 1), ("avg", 2), ("max", 2)):
        out = poolbn_forward(x, params, pool_type=pool_type,
                             kernel_size=K, stride=s, padding=pad)
        out = jax.block_until_ready(out)
        ref = poolbn_reference(x, params, pool_type=pool_type,
                               kernel_size=K, stride=s, padding=pad)
        Ho = (H + 2 * pad - K) // s + 1
        assert out.shape == ref.shape == (N, C, Ho, Ho)
        assert bool(jnp.allclose(out, ref, atol=1e-4, rtol=1e-4)), \
            f"Pallas kernel mismatch vs reference ({pool_type}, stride={s})"

    print("KERNEL_OK")
</pallas_src>

<mosaic_0001>
module attributes {stable_mosaic.version = 11 : i64} {
  func.func @_poolbn_kernel(%arg0: i32, %arg1: memref<1x16x64xf32, #tpu.memory_space<vmem>>, %arg2: memref<1x64xf32, #tpu.memory_space<vmem>>, %arg3: memref<1x64xf32, #tpu.memory_space<vmem>>, %arg4: memref<1x16x64xf32, #tpu.memory_space<vmem>>, %arg5: memref<1x18x72xf32, #tpu.memory_space<vmem>>) attributes {dimension_semantics = [#tpu.dimension_semantics<parallel>], iteration_bounds = array<i64: 2>, scalar_prefetch = 0 : i64, scratch_operands = 1 : i64, tpu.core_type = #tpu.core_type<tc>, window_params = [{transform_indices = @transform_0, window_bounds = array<i64: 1, 16, 64>}, {pipeline_mode = #tpu.pipeline_mode<synchronous>, transform_indices = @transform_1, window_bounds = array<i64: 1, 64>}, {pipeline_mode = #tpu.pipeline_mode<synchronous>, transform_indices = @transform_2, window_bounds = array<i64: 1, 64>}, {transform_indices = @transform_3, window_bounds = array<i64: 1, 16, 64>}]} {
    %cst = arith.constant 0xFF800000 : f32
    %0 = vector.broadcast %cst : f32 to vector<1x1x72xf32>
    %c0 = arith.constant 0 : index
    %c0_0 = arith.constant 0 : index
    %c0_1 = arith.constant 0 : index
    %1 = vector.load %arg5[%c0, %c0_0, %c0_1] : memref<1x18x72xf32, #tpu.memory_space<vmem>>, vector<1x1x72xf32>
    tpu.vector_store %arg5[%c0, %c0_0, %c0_1], %0 {strides = array<i32>} : memref<1x18x72xf32, #tpu.memory_space<vmem>>, vector<1x1x72xf32>,
    %cst_2 = arith.constant 0xFF800000 : f32
    %2 = vector.broadcast %cst_2 : f32 to vector<1x1x72xf32>
    %c0_3 = arith.constant 0 : index
    %c17 = arith.constant 17 : index
    %c0_4 = arith.constant 0 : index
    %3 = vector.load %arg5[%c0_3, %c17, %c0_4] : memref<1x18x72xf32, #tpu.memory_space<vmem>>, vector<1x1x72xf32>
    tpu.vector_store %arg5[%c0_3, %c17, %c0_4], %2 {strides = array<i32>} : memref<1x18x72xf32, #tpu.memory_space<vmem>>, vector<1x1x72xf32>,
    %cst_5 = arith.constant 0xFF800000 : f32
    %4 = vector.broadcast %cst_5 : f32 to vector<1x18x4xf32>
    %c0_6 = arith.constant 0 : index
    %c0_7 = arith.constant 0 : index
    %c0_8 = arith.constant 0 : index
    %5 = vector.load %arg5[%c0_6, %c0_7, %c0_8] : memref<1x18x72xf32, #tpu.memory_space<vmem>>, vector<1x18x4xf32>
    tpu.vector_store %arg5[%c0_6, %c0_7, %c0_8], %4 {strides = array<i32>} : memref<1x18x72xf32, #tpu.memory_space<vmem>>, vector<1x18x4xf32>,
    %cst_9 = arith.constant 0xFF800000 : f32
    %6 = vector.broadcast %cst_9 : f32 to vector<1x18x4xf32>
    %c0_10 = arith.constant 0 : index
    %c0_11 = arith.constant 0 : index
    %c68 = arith.constant 68 : index
    %7 = vector.load %arg5[%c0_10, %c0_11, %c68] : memref<1x18x72xf32, #tpu.memory_space<vmem>>, vector<1x18x4xf32>
    tpu.vector_store %arg5[%c0_10, %c0_11, %c68], %6 {strides = array<i32>} : memref<1x18x72xf32, #tpu.memory_space<vmem>>, vector<1x18x4xf32>,
    %c0_12 = arith.constant 0 : index
    %c0_13 = arith.constant 0 : index
    %c0_14 = arith.constant 0 : index
    %8 = vector.load %arg1[%c0_12, %c0_13, %c0_14] : memref<1x16x64xf32, #tpu.memory_space<vmem>>, vector<1x16x64xf32>
    %c0_15 = arith.constant 0 : index
    %c0_16 = arith.constant 0 : index
    %9 = vector.load %arg2[%c0_15, %c0_16] : memref<1x64xf32, #tpu.memory_space<vmem>>, vector<1x64xf32>
    %10 = vector.shape_cast %9 : vector<1x64xf32> to vector<1x1x64xf32>
    %11 = vector.broadcast %10 : vector<1x1x64xf32> to vector<1x16x64xf32>
    %12 = arith.mulf %8, %11 : vector<1x16x64xf32>
    %c0_17 = arith.constant 0 : index
    %c0_18 = arith.constant 0 : index
    %13 = vector.load %arg3[%c0_17, %c0_18] : memref<1x64xf32, #tpu.memory_space<vmem>>, vector<1x64xf32>
    %14 = vector.shape_cast %13 : vector<1x64xf32> to vector<1x1x64xf32>
    %15 = vector.broadcast %14 : vector<1x1x64xf32> to vector<1x16x64xf32>
    %16 = arith.addf %12, %15 : vector<1x16x64xf32>
    %c0_19 = arith.constant 0 : index
    %c1 = arith.constant 1 : index
    %c4 = arith.constant 4 : index
    %17 = vector.load %arg5[%c0_19, %c1, %c4] : memref<1x18x72xf32, #tpu.memory_space<vmem>>, vector<1x16x64xf32>
    tpu.vector_store %arg5[%c0_19, %c1, %c4], %16 {strides = array<i32>} : memref<1x18x72xf32, #tpu.memory_space<vmem>>, vector<1x16x64xf32>,
    %c0_20 = arith.constant 0 : index
    %c0_21 = arith.constant 0 : index
    %c0_22 = arith.constant 0 : index
    %18 = vector.load %arg5[%c0_20, %c0_21, %c0_22] : memref<1x18x72xf32, #tpu.memory_space<vmem>>, vector<1x16x72xf32>
    %c0_23 = arith.constant 0 : index
    %c1_24 = arith.constant 1 : index
    %c0_25 = arith.constant 0 : index
    %19 = vector.load %arg5[%c0_23, %c1_24, %c0_25] : memref<1x18x72xf32, #tpu.memory_space<vmem>>, vector<1x16x72xf32>
    %20 = arith.maximumf %18, %19 : vector<1x16x72xf32>
    %c0_26 = arith.constant 0 : index
    %c2 = arith.constant 2 : index
    %c0_27 = arith.constant 0 : index
    %21 = vector.load %arg5[%c0_26, %c2, %c0_27] : memref<1x18x72xf32, #tpu.memory_space<vmem>>, vector<1x16x72xf32>
    %22 = arith.maximumf %20, %21 : vector<1x16x72xf32>
    %23 = vector.extract_strided_slice %22 {offsets = [0, 0, 0], sizes = [1, 16, 64], strides = [1, 1, 1]} : vector<1x16x72xf32> to vector<1x16x64xf32>
    %24 = vector.extract_strided_slice %22 {offsets = [0, 0, 4], sizes = [1, 16, 64], strides = [1, 1, 1]} : vector<1x16x72xf32> to vector<1x16x64xf32>
    %25 = arith.maximumf %23, %24 : vector<1x16x64xf32>
    %26 = vector.extract_strided_slice %22 {offsets = [0, 0, 8], sizes = [1, 16, 64], strides = [1, 1, 1]} : vector<1x16x72xf32> to vector<1x16x64xf32>
    %27 = arith.maximumf %25, %26 : vector<1x16x64xf32>
    %c0_28 = arith.constant 0 : index
    %c0_29 = arith.constant 0 : index
    %c0_30 = arith.constant 0 : index
    %28 = vector.load %arg4[%c0_28, %c0_29, %c0_30] : memref<1x16x64xf32, #tpu.memory_space<vmem>>, vector<1x16x64xf32>
    tpu.vector_store %arg4[%c0_28, %c0_29, %c0_30], %27 {strides = array<i32>} : memref<1x16x64xf32, #tpu.memory_space<vmem>>, vector<1x16x64xf32>,
    return
  }
  func.func @transform_0(%arg0: i32) -> (i32, i32, i32) {
    %c0_i32 = arith.constant 0 : i32
    %c0_i32_0 = arith.constant 0 : i32
    %c0_i32_1 = arith.constant 0 : i32
    return %arg0, %c0_i32, %c0_i32_0 : i32, i32, i32
  }
  func.func @transform_1(%arg0: i32) -> (i32, i32) {
    %c0_i32 = arith.constant 0 : i32
    %c0_i32_0 = arith.constant 0 : i32
    %c0_i32_1 = arith.constant 0 : i32
    return %c0_i32, %c0_i32_0 : i32, i32
  }
  func.func @transform_2(%arg0: i32) -> (i32, i32) {
    %c0_i32 = arith.constant 0 : i32
    %c0_i32_0 = arith.constant 0 : i32
    %c0_i32_1 = arith.constant 0 : i32
    return %c0_i32, %c0_i32_0 : i32, i32
  }
  func.func @transform_3(%arg0: i32) -> (i32, i32, i32) {
    %c0_i32 = arith.constant 0 : i32
    %c0_i32_0 = arith.constant 0 : i32
    %c0_i32_1 = arith.constant 0 : i32
    return %arg0, %c0_i32, %c0_i32_0 : i32, i32, i32
  }
}

</mosaic_0001>

<bundles_post_ra>
// kernel: tpu_custom_call.1
= control target key start
LH: loop header
LB: loop body
LE: loop exit
PB: predicated region body
PF: predicated region fallthrough
CT: control target
= control target key end

     0   :  { %8 = vsyncpa [#allocation4], 0  ;;  %s711_s0 = inlined_call_operand.hbm [shape: f32[2,16,64], index: 0, kind: input, shape index: {}]   ;;  %s712_s1 = inlined_call_operand.vmem [shape: f32[1,64], index: 1, kind: input, shape index: {}]   ;;  %s713_s2 = inlined_call_operand.vmem [shape: f32[1,64], index: 2, kind: input, shape index: {}]   ;;  %s714_s3 = inlined_call_operand.hbm [shape: f32[2,16,64], index: 3, kind: output, shape index: {}]  }
   0x1   :  { %10 = vsyncpa [#allocation4 + $0x1], 0 }
   0x2   :  { %11 = vsyncpa [#allocation5], 0 }
   0x3   :  { %13 = vsyncpa [#allocation5 + $0x1], 0  ;;  %s547_s12 = smov 0   ;;  %s549_s13 = smov 0  }
   0x4   :  { %s551_s14 = smov 0   ;;  %s553_s15 = smov 0  }
   0x5 LB: > { %s568_s16 = sadd.s32 4294967295, %s515_s15   ;;  %s351_s17 = sadd.s32 4294967294, %s515_s15   ;;  %s515_s15 = sphi %s553_s15, %s729_s15   ;;  %s511_s14 = sphi %s551_s14, %s728_s14   ;;  %s507_s13 = sphi %s549_s13, %s727_s13   ;;  %s503_s12 = sphi %s547_s12, %s726_s12  }
   0x6   : > { %s572_s18 = sadd.s32 1, %s515_s15   ;;  %s26_s19 = sadd.s32 1, %s511_s14 }
   0x7   : > { %s23_s20 = ssub.s32 %s515_s15, %s572_s18  ;;  %p33_p0 = scmp.ne.s32.totalorder %s511_s14, %s507_s13 }
   0x8   : > { %p24_p1 = scmp.eq.s32.totalorder %s23_s20, 0  ;;  %p34_p2 = scmp.eq.s32.totalorder %s515_s15, 0 }
   0x9   : > { %p39_p3 = scmp.ne.s32.totalorder %s507_s13, %s503_s12  ;;  %p40_p4 = scmp.eq.s32.totalorder %s568_s16, 0 }
   0xa   : > { %s584_s21 = scalar_select %p24_p1, %s511_s14, %s26_s19  }
   0xb   : > { %p586_p5 = por %p34_p2, %p33_p0  ;;  %p590_p6 = por %p40_p4, %p39_p3 }
   0xc   : > { %p105_p7 = scmp.eq.s32.totalorder %s568_s16, 1  ;;  %p111_p8 = scmp.eq.s32.totalorder %s351_s17, 1 }
   0xd   : > { %s718_s23 = scalar_select %p590_p6, 1, 0 }
   0xe   : > { %p381_p10 = scmp.lt.s32.totalorder %s515_s15, 2  ;;  %p597_p11 = por %p105_p7, %p33_p0 }
   0xf   : > { %p601_p12 = por %p111_p8, %p39_p3  ;;  %s137_s26 = sand.u32 1, %s511_s14  }
  0x10   : > { %s719_s24 = scalar_select %p597_p11, 1, 0 }
  0x11   : > { %s720_s25 = scalar_select %p601_p12, 1, 0 }
  0x12   : > { %s367_s27 = sshll.u32 %s515_s15, 8  ;;  %s354_s28 = sshll.u32 %s137_s26, 4 }
  0x13   : > { %s610_s4 = scalar_lea.hbm %s711_s0, %s367_s27  ;;  %s141_s5 = scalar_lea.vmem [#allocation3], %s354_s28 }
  0x14   : > { %s148_s6 = sshll.u32 %s141_s5, 4  ;;  %p614_p13 = pnand %p381_p10, %p586_p5  ;;  %s618_s6 = int_to_ptr.vmem [resolvable:$true] %s148_s6 }
  0x15   : > { %s620_s8 = scalar_lea.sflag [#allocation4], %s137_s26  ;;  %s423_s9 = scalar_lea.hbm %s610_s4, 256 }
  0x16   : > { %p424_p0 = scmp.ne.s32.totalorder %s610_s4, %s423_s9  ;;  %p425_p1 = pneg %p614_p13 }
  0x17   : > { %s428_s17 = scalar_lea.hbm %s711_s0, 512  ;;  %p429_p4 = scmp.lt.s32.totalorder %s610_s4, %s711_s0 }
  0x18   : > { %p426_p2 = pnand %p425_p1, %p424_p0  ;;  %p430_p5 = scmp.lt.s32.totalorder %s428_s17, %s423_s9 }
  0x1a   : > { %p427_p3 = pneg %p426_p2  ;;  %p431_p7 = por %p430_p5, %p429_p4 }
  0x1c   : > { %p432_p8 = pnand %p431_p7, %p427_p3 }
  0x1e   : > { %435 = shalt.err (!%p432_p8)
}
  0x1f   : > { %s436_s22 = scalar_lea.vmem %s618_s6, 256  ;;  %s517_s26 = smov [#allocation3]  }
  0x20   : > { %p437_p10 = scmp.ne.s32.totalorder %s618_s6, %s436_s22  ;;  %s441_s27 = sshll.u32 %s517_s26, 4  ;;  %s442_s27 = int_to_ptr.vmem [resolvable:$false] %s441_s27 }
  0x21   : > { %s443_s28 = scalar_lea.vmem %s442_s27, 512  ;;  %p444_p2 = scmp.lt.s32.totalorder %s618_s6, %s442_s27 }
  0x22   : > { %p439_p9 = pnand %p437_p10, %p425_p1  ;;  %p445_p12 = scmp.lt.s32.totalorder %s443_s28, %s436_s22 }
  0x24   : > { %p440_p0 = pneg %p439_p9  ;;  %p446_p11 = por %p445_p12, %p444_p2 }
  0x26   : > { %p447_p6 = pnand %p446_p11, %p440_p0 }
  0x28   : > { %450 = shalt.err (!%p447_p6)
}
  0x29   : > { %s518_s29 = smov 128   ;;  %s519_s30 = smov 8  }
  0x2a   : > { %376 = dma.hbm_to_vmem [thread:$0]  (!%p614_p13), %s610_s4, 256, %s618_s6, %s620_s8, %s518_s29, %s518_s29, %s519_s30  }
  0x2b   : > { %p357_p9 = scmp.ge.s32.totalorder %s515_s15, 1  ;;  %p156_p1 = scmp.lt.s32.totalorder %s515_s15, 3 }
  0x2d   : > { %p157_p3 = pnand %p357_p9, %p156_p1 }
  0x2e   : > { %s644_s5 = sand.u32 (!%p157_p3), 1, %s507_s13   ;;  %p722_p6 = scmp.ne.s32.totalorder (!%p157_p3), %s718_s23, 0 }
  0x2f   : > { %160 = sbr.rel (%p157_p3) target bundleno = 329 (0x149), region = 32  ;;  %s358_s9 = sshll.u32 (!%p157_p3), %s644_s5, 4 }
  0x30   : > { %s163_s10 = scalar_lea.sflag (!%p157_p3), [#allocation4], %s644_s5  ;;  %s166_s11 = scalar_lea.vmem (!%p157_p3), [#allocation3], %s358_s9 }
  0x34   : > { %494 = dma.done.wait (%p722_p6), %s163_s10, 256  }
  0x35   : > { %496 = vsyncadd (%p722_p6), %s163_s10, 4294967040  ;;  %vm189_vm0 = vcmask 581632   ;;  %vm192_vm1 = vcmask 31744   ;;  %vm197_vm2 = vcmask 589344   ;;  %v520_v0 = vmov -inf   ;;  %v202_v1 = vld [vmem:[%s166_s11] sm:$0xff] }
  0x36   : > { %190 = vst.msk [vmem:[#allocation2] sm:$0x1] %vm189_vm0, %v520_v0  ;;  %191 = vst.msk [vmem:[#allocation2 + $0x11] sm:$0x1] %vm189_vm0, %v520_v0  ;;  %vm195_vm3 = vcmask 25600   ;;  %vm200_vm4 = vcmask 583200  }
  0x37   : > { %194 = vst.msk [vmem:[#allocation2 + $0x8] sm:$0xff] %vm192_vm1, %v520_v0  ;;  %193 = vst.msk [vmem:[#allocation2] sm:$0xff] %vm192_vm1, %v520_v0  ;;  %v203_v2 = vld [vmem:[%s166_s11 + $0x8] sm:$0xff]  ;;  %s521_s8 = smov 4   ;;  %vm230_vm5 = vcmask 556064   ;;  %s522_s17 = smov 120  }
  0x38   : > { %199 = vst.msk [vmem:[#allocation2 + $0x8] sm:$0xff] %vm197_vm2, %v520_v0  ;;  %198 = vst.msk [vmem:[#allocation2] sm:$0xff] %vm197_vm2, %v520_v0  ;;  %v360_v3 = vld [vmem:[%s712_s1] ss:$0 sm:$0xff]  ;;  %s523_s19 = smov 124   ;;  %vm261_vm6 = vcmask 523264  }
  0x39   : > { %196 = vst.msk [vmem:[#allocation2 + $0x10] sm:$0x3] %vm195_vm3, %v520_v0  ;;  %v211_v4 = vmul.f32 %v360_v3, %v202_v1  ;;  %v212_v5 = vmul.f32 %v360_v3, %v203_v2  ;;  %v361_v6 = vld [vmem:[%s713_s2] ss:$0 sm:$0xff]  ;;  %s188_s20 = scalar_lea.vmem [#allocation6], %s358_s9  ;;  %s368_s22 = sshll.u32 %s568_s16, 8 }
  0x3a   : > { %201 = vst.msk [vmem:[#allocation2 + $0x10] sm:$0x3] %vm200_vm4, %v520_v0  ;;  %s278_s26 = sshll.u32 %s188_s20, 4  ;;  %s666_s29 = scalar_lea.hbm %s714_s3, %s368_s22  ;;  %s668_s26 = int_to_ptr.vmem [resolvable:$true] %s278_s26 }
  0x3b   : > { %v220_v7 = vadd.f32 %v361_v6, %v211_v4  ;;  %v221_v8 = vadd.f32 %v361_v6, %v212_v5  ;;  %s265_s30 = scalar_lea.sflag [#allocation5], %s644_s5  ;;  %s451_s10 = scalar_lea.vmem %s668_s26, 256 }
  0x3c   : > { %p452_p11 = scmp.ne.s32.totalorder %s668_s26, %s451_s10  ;;  %p723_p12 = scmp.ne.s32.totalorder %s719_s24, 0 }
  0x3d   : > { %224 = vrot.lane.b32.xlu0 %v220_v7, %s521_s8  ;;  %s524_s16 = smov [#allocation6]  }
  0x3e   : > { %p453_p13 = pnand %p452_p11, %p723_p12  ;;  %s455_s9 = sshll.u32 %s524_s16, 4  ;;  %s456_s9 = int_to_ptr.vmem [resolvable:$false] %s455_s9 }
  0x3f   : > { %s457_s11 = scalar_lea.vmem %s456_s9, 512  ;;  %p458_p5 = scmp.lt.s32.totalorder %s668_s26, %s456_s9 }
  0x40   : > { %p454_p4 = pneg %p453_p13  ;;  %p459_p7 = scmp.lt.s32.totalorder %s457_s11, %s451_s10 }
  0x41   : > { %226 = vrot.lane.b32.xlu0 %v221_v8, %s521_s8 }
  0x42   : > { %p460_p8 = por %p459_p7, %p458_p5 }
  0x44   : > { %p461_p10 = pnand %p460_p8, %p454_p4 }
  0xaf   : > { %v225_v9 = vpop.permute.xlu0 %224 }
  0xb0   : > { %231 = vst.msk [vmem:[#allocation2 + $0x1] sm:$0xff] %vm230_vm5, %v225_v9 }
  0xb3   : > { %v227_v10 = vpop.permute.xlu0 %226 }
  0xb4   : > { %232 = vst.msk [vmem:[#allocation2 + $0x9] sm:$0xff] %vm230_vm5, %v227_v10 }
  0xb7   : > { %v233_v11 = vld [vmem:[#allocation2] sm:$0xff] }
  0xb8   : > { %v235_v12 = vld [vmem:[#allocation2 + $0x1] sm:$0xff] }
  0xb9   : > { %v237_v13 = vmax.f32 %v233_v11, %v235_v12 }
  0xbb   : > { %v239_v14 = vld [vmem:[#allocation2 + $0x2] sm:$0xff]  ;;  %v240_v19 = vld [vmem:[#allocation2 + $0xa] sm:$0xff] }
  0xbc   : > { %v234_v15 = vld [vmem:[#allocation2 + $0x8] sm:$0xff]  ;;  %v241_v17 = vmax.f32 %v237_v13, %v239_v14 }
  0xbd   : > { %v236_v16 = vld [vmem:[#allocation2 + $0x9] sm:$0xff] }
  0xbe   : > { %v238_v18 = vmax.f32 %v234_v15, %v236_v16  ;;  %253 = vrot.lane.b32.xlu0 %v241_v17, %s522_s17  ;;  %245 = vrot.lane.b32.xlu1 %v241_v17, %s523_s19 }
  0xc0   : > { %v242_v20 = vmax.f32 %v238_v18, %v240_v19 }
  0xc2   : > { %247 = vrot.lane.b32.xlu1 %v242_v20, %s523_s19 }
  0xc6   : > { %255 = vrot.lane.b32.xlu1 %v242_v20, %s522_s17 }
 0x130   : > { %v246_v21 = vpop.permute.xlu1 %245  ;;  %v254_v23 = vpop.permute.xlu0 %253 }
 0x131   : > { %v251_v22 = vmax.f32 %v241_v17, %v246_v21 }
 0x133   : > { %v259_v24 = vmax.f32 %v251_v22, %v254_v23 }
 0x134   : > { %v248_v25 = vpop.permute.xlu1 %247 }
 0x135   : > { %262 = vst.msk [vmem:[%s188_s20] sm:$0xff] %vm261_vm6, %v259_v24  ;;  %v252_v26 = vmax.f32 %v242_v20, %v248_v25 }
 0x138   : > { %v256_v27 = vpop.permute.xlu1 %255 }
 0x139   : > { %v260_v28 = vmax.f32 %v252_v26, %v256_v27 }
 0x13b   : > { %263 = vst.msk [vmem:[%s188_s20 + $0x8] sm:$0xff] %vm261_vm6, %v260_v28 }
 0x13c   : > { %464 = shalt.err (!%p461_p10)
}
 0x13d   : > { %s465_s4 = scalar_lea.hbm %s666_s29, 256  ;;  %s469_s7 = scalar_lea.hbm %s714_s3, 512 }
 0x13e   : > { %p466_p0 = scmp.ne.s32.totalorder %s666_s29, %s465_s4  ;;  %p470_p1 = scmp.lt.s32.totalorder %s666_s29, %s714_s3 }
 0x13f   : > { %p471_p3 = scmp.lt.s32.totalorder %s469_s7, %s465_s4 }
 0x140   : > { %p467_p2 = pnand %p466_p0, %p723_p12 }
 0x141   : > { %p472_p6 = por %p471_p3, %p470_p1 }
 0x142   : > { %p468_p9 = pneg %p467_p2 }
 0x144   : > { %p473_p11 = pnand %p472_p6, %p468_p9 }
 0x146   : > { %476 = shalt.err (!%p473_p11)
}
 0x147   : > { %s525_s19 = smov 128   ;;  %s526_s20 = smov 8  }
 0x148   : > { %371 = dma.vmem_to_hbm [thread:$0]  (%p723_p12), %s668_s26, 256, %s666_s29, %s265_s30, %s525_s19, %s525_s19, %s526_s20  }
 0x149 PF: > { %s293_s22 = sand.u32 1, %s503_s12   ;;  %p724_p13 = scmp.ne.s32.totalorder %s720_s25, 0 }
 0x14a   : > { %p725_p4 = scmp.ge.s32.totalorder %s515_s15, 2  ;;  %s294_s27 = scalar_lea.sflag [#allocation5], %s293_s22 }
 0x14c   : > { %p378_p5 = pnand %p725_p4, %p724_p13 }
 0x14e   : > { %p379_p7 = pneg %p378_p5 }
 0x150   : > { %498 = dma.done.wait (%p379_p7), %s294_s27, 256  }
 0x151   : > { %500 = vsyncadd (%p379_p7), %s294_s27, 4294967040  ;;  %p16_p8 = scmp.ge.s32.totalorder %s572_s18, 4   ;;  %s726_s12 = smov %s507_s13 }
 0x152   : > { %s727_s13 = smov %s511_s14  ;;  %s728_s14 = smov %s584_s21 }
 0x153   : > { %s729_s15 = smov %s572_s18  ;;  %18 = sbr.rel (!%p16_p8) target bundleno = 5 (0x5), region = 77 }
 0x158   :  { %299 = vsyncpa [#allocation4], 1 }
 0x159   :  { %301 = vsyncpa [#allocation4 + $0x1], 1 }
 0x15a   :  { %302 = vsyncpa [#allocation5], 1 }
 0x15b   :  { %304 = vsyncpa [#allocation5 + $0x1], 1 }

</bundles_post_ra>
